<compile_context>
chip_gen: v6e
topology: v6e:2x2x1
jax: 0.10.0
libtpu: 0.0.40
codegen_flags: <defaults>
</compile_context>

<pallas_src>
import math
import numpy as np
import jax
import jax.numpy as jnp
from jax.experimental import pallas as pl
from jax.experimental.pallas import tpu as pltpu


# ----------------------------- host-side helpers -----------------------------

def _gaussian_1d(size, sigma):
    x = np.arange(-size, size + 1, dtype=np.float64)
    g = np.exp(-0.5 * x * x / (sigma * sigma))
    return (g / g.sum()).astype(np.float32)


def _band_same(n, g):
    """(n, n) band matrix B with B[i, m] = g[m - i + P] (taps clipped at the
    edges).  Left-multiplying by B == 1-D 'same' correlation with zero padding,
    i.e. exactly F.conv2d(padding=P) along that axis."""
    p = (len(g) - 1) // 2
    m = np.zeros((n, n), dtype=np.float32)
    for i in range(n):
        lo, hi = max(0, i - p), min(n, i + p + 1)
        m[i, lo:hi] = g[lo - i + p:hi - i + p]
    return m


def _cdiv(a, b):
    return -(-a // b)


def _choose_tc(nc, h, w):
    """Channel maps per grid step.  TC*W is forced to a multiple of 128 (dense
    lanes), targets ~512 lanes, and is capped so the working set stays well
    inside the scoped-VMEM budget on every TPU generation (incl. v7x 64 MiB)."""
    base = 128 // math.gcd(w, 128)          # smallest tc with (tc*w) % 128 == 0

    def fits(t):
        lanes = t * w
        blk = 4 * h * lanes                  # one f32 (H, TC*W) map
        return 18 * blk + 2 * 4 * lanes * lanes < 24 * (2 ** 20)

    tc = base
    while tc * w < 512 and tc < nc and fits(tc + base):
        tc += base
    while tc > base and not fits(tc):
        tc -= base
    return tc


# --------------------------------- kernel ------------------------------------

def _sanet_kernel(cu_ref, cvb_ref, a_ref, b_ref,
                  ssim_out_ref, se_out_ref, ssim_acc, se_acc):
    """Grid = (core, chunk).  One step == TC channel maps, laid out (H, TC*W).

    cu_ref  : (H, H)        row-direction Gaussian band matrix
    cvb_ref : (TCW, TCW)    block-diag column-direction band matrix (TC blocks)
    a_ref   : (H, TCW)      img1 block
    b_ref   : (H, TCW)      img2 block
    outputs : (8, 128) per core, broadcast-filled with that core's partial sums
    scratch : (H, TCW) f32 element-wise accumulators (per core)
    """
    step = pl.program_id(1)

    @pl.when(step == 0)
    def _():
        # per-core init (leading grid axis is "parallel")
        ssim_acc[...] = jnp.zeros_like(ssim_acc)
        se_acc[...] = jnp.zeros_like(se_acc)

    a = a_ref[...]                      # (H, TCW) f32
    b = b_ref[...]
    cu = cu_ref[...]                    # (H, H)
    cvb = cvb_ref[...]                  # (TCW, TCW)

    def dconv(x):
        # separable Gaussian 'same' conv of all TC maps at once, lane-dense:
        t = jnp.dot(cu, x, preferred_element_type=jnp.float32)       # (H, TCW)
        return jnp.dot(t, cvb, preferred_element_type=jnp.float32)   # (H, TCW)

    mean1 = dconv(a)
    mean2 = dconv(b)
    e11 = dconv(a * a)
    e22 = dconv(b * b)
    e12 = dconv(a * b)

    mean1_sq = mean1 * mean1
    mean2_sq = mean2 * mean2
    mean_12 = mean1 * mean2
    sigma1_sq = e11 - mean1_sq
    sigma2_sq = e22 - mean2_sq
    sigma_12 = e12 - mean_12

    c1 = 0.01 ** 2
    c2 = 0.03 ** 2
    ssim = ((2.0 * mean_12 + c1) * (2.0 * sigma_12 + c2)
            / ((mean1_sq + mean2_sq + c1) * (sigma1_sq + sigma2_sq + c2)))

    d = a - b
    # cheap VPU accumulation; the cross-lane reduce happens once per core.
    ssim_acc[...] += ssim
    se_acc[...] += d * d

    @pl.when(step == pl.num_programs(1) - 1)
    def _():
        ssim_out_ref[...] = jnp.broadcast_to(jnp.sum(ssim_acc[...]),
                                             ssim_out_ref.shape)
        se_out_ref[...] = jnp.broadcast_to(jnp.sum(se_acc[...]),
                                           se_out_ref.shape)


# -------------------------------- wrapper -------------------------------------

def sanet_loss(img1, img2, in_channels, size=5, sigma=1.5):
    assert img1.shape == img2.shape
    n, c, h, w = img1.shape
    assert c == in_channels
    nc = n * c

    tc = _choose_tc(nc, h, w)
    tcw = tc * w
    total_chunks = _cdiv(nc, tc)
    g_cores = min(2, total_chunks)          # v7x megacore split; harmless on 1-TC chips
    chunks_per_core = _cdiv(total_chunks, g_cores)
    nc_pad = g_cores * chunks_per_core * tc
    pad_maps = nc_pad - nc                  # all-zero channel maps (accounted below)

    # separable Gaussian: outer(g, g) == PyTorch's normalized 2-D kernel
    g = _gaussian_1d(size, sigma)
    cu = jnp.asarray(_band_same(h, g))                                  # (H, H)
    cvb = jnp.asarray(np.kron(np.eye(tc, dtype=np.float32),
                              _band_same(w, g).T))                      # (TCW, TCW)

    def prep(x):
        # (N, C, H, W) -> lane-dense slab (H, NC_pad * W); no spatial zero-pad.
        x = x.astype(jnp.float32).reshape(nc, h, w).transpose(1, 0, 2)
        x = x.reshape(h, nc * w)
        if pad_maps:
            x = jnp.pad(x, ((0, 0), (0, pad_maps * w)))
        return x

    a = prep(img1)
    b = prep(img2)

    blk_bytes = 4 * h * tcw
    vmem_est = 18 * blk_bytes + 2 * 4 * tcw * tcw + 4 * h * h
    vmem_limit = int(min(60 * (2 ** 20), max(32 * (2 ** 20), 3 * vmem_est)))

    ssim_out, se_out = pl.pallas_call(
        _sanet_kernel,
        out_shape=(jax.ShapeDtypeStruct((g_cores * 8, 128), jnp.float32),
                   jax.ShapeDtypeStruct((g_cores * 8, 128), jnp.float32)),
        grid=(g_cores, chunks_per_core),
        in_specs=[
            # constant index map -> fetched once, stays VMEM-resident
            pl.BlockSpec((h, h), lambda cc, i: (0, 0)),
            pl.BlockSpec((tcw, tcw), lambda cc, i: (0, 0)),
            pl.BlockSpec((h, tcw), lambda cc, i: (0, cc * chunks_per_core + i)),
            pl.BlockSpec((h, tcw), lambda cc, i: (0, cc * chunks_per_core + i)),
        ],
        out_specs=(
            pl.BlockSpec((8, 128), lambda cc, i: (cc, 0)),
            pl.BlockSpec((8, 128), lambda cc, i: (cc, 0)),
        ),
        scratch_shapes=[pltpu.VMEM((h, tcw), jnp.float32),
                        pltpu.VMEM((h, tcw), jnp.float32)],
        compiler_params=pltpu.CompilerParams(
            dimension_semantics=("parallel", "arbitrary"),
            vmem_limit_bytes=vmem_limit),
    )(cu, cvb, a, b)

    num = float(nc * h * w)
    # each zero-padded channel map contributes exactly H*W to the ssim sum and
    # exactly 0 to the squared-error sum -> exact correction here.
    ssim_sum = jnp.sum(ssim_out[0::8, 0]) - float(pad_maps * h * w)
    se_sum = jnp.sum(se_out[0::8, 0])

    loss_c = 1.0 - ssim_sum / num            # SSIM loss (size_average=True)
    loss_e = se_sum / num                    # MSE
    return loss_c * 0.001 + loss_e


# ------------------------- plain-JAX reference check --------------------------

def reference_sanet_loss(img1, img2, in_channels, size=5, sigma=1.5):
    """Plain-JAX replica of the PyTorch module (for a correctness check)."""
    x, y = np.mgrid[-size:size + 1, -size:size + 1]
    kernel = np.exp(-0.5 * (x * x + y * y) / (sigma * sigma))
    kernel /= kernel.sum()
    weight = jnp.asarray(np.tile(kernel, (in_channels, 1, 1, 1)), jnp.float32)

    def conv(z):
        return jax.lax.conv_general_dilated(
            z, weight, (1, 1), ((size, size), (size, size)),
            dimension_numbers=("NCHW", "OIHW", "NCHW"),
            feature_group_count=in_channels,
            precision=jax.lax.Precision.HIGHEST)

    mean1 = conv(img1)
    mean2 = conv(img2)
    mean1_sq = mean1 * mean1
    mean2_sq = mean2 * mean2
    mean_12 = mean1 * mean2
    sigma1_sq = conv(img1 * img1) - mean1_sq
    sigma2_sq = conv(img2 * img2) - mean2_sq
    sigma_12 = conv(img1 * img2) - mean_12
    c1 = 0.01 ** 2
    c2 = 0.03 ** 2
    ssim = ((2 * mean_12 + c1) * (2 * sigma_12 + c2)
            / ((mean1_sq + mean2_sq + c1) * (sigma1_sq + sigma2_sq + c2)))
    loss_c = 1.0 - jnp.mean(ssim)
    loss_e = jnp.mean((img1 - img2) ** 2)
    return loss_c * 0.001 + loss_e


if __name__ == "__main__":
    key = jax.random.PRNGKey(0)

    def run_case(n, c, h, w):
        k1, k2 = jax.random.split(jax.random.fold_in(key, n * 1000 + c * 10 + h))
        img1 = jax.random.normal(k1, (n, c, h, w), dtype=jnp.float32)
        img2 = jax.random.normal(k2, (n, c, h, w), dtype=jnp.float32)
        out = jax.block_until_ready(sanet_loss(img1, img2, in_channels=c))
        ref = jax.block_until_ready(reference_sanet_loss(img1, img2, c))
        if not np.isfinite(float(out)) or abs(float(out) - float(ref)) > 1e-3:
            raise AssertionError(
                f"mismatch at {(n, c, h, w)}: pallas={float(out)} ref={float(ref)}")

    run_case(2, 4, 16, 16)    # primary shape (one block, one core)
    run_case(3, 5, 16, 16)    # N*C not divisible by TC -> zero-channel padding
    run_case(5, 16, 16, 16)   # multi-chunk + 2-way core split + padded tail chunk
    print("KERNEL_OK")
</pallas_src>

<mosaic_0001>
module attributes {stable_mosaic.version = 11 : i64} {
  func.func @_sanet_kernel(%arg0: i32, %arg1: i32, %arg2: memref<16x16xf32, #tpu.memory_space<vmem>>, %arg3: memref<128x128xf32, #tpu.memory_space<vmem>>, %arg4: memref<16x128xf32, #tpu.memory_space<vmem>>, %arg5: memref<16x128xf32, #tpu.memory_space<vmem>>, %arg6: memref<8x128xf32, #tpu.memory_space<vmem>>, %arg7: memref<8x128xf32, #tpu.memory_space<vmem>>, %arg8: memref<16x128xf32, #tpu.memory_space<vmem>>, %arg9: memref<16x128xf32, #tpu.memory_space<vmem>>) attributes {dimension_semantics = [#tpu.dimension_semantics<parallel>, #tpu.dimension_semantics<arbitrary>], iteration_bounds = array<i64: 1, 1>, scalar_prefetch = 0 : i64, scratch_operands = 2 : i64, tpu.core_type = #tpu.core_type<tc>, window_params = [{pipeline_mode = #tpu.pipeline_mode<synchronous>, transform_indices = @transform_0, window_bounds = array<i64: 16, 16>}, {pipeline_mode = #tpu.pipeline_mode<synchronous>, transform_indices = @transform_1, window_bounds = array<i64: 128, 128>}, {transform_indices = @transform_2, window_bounds = array<i64: 16, 128>}, {transform_indices = @transform_3, window_bounds = array<i64: 16, 128>}, {transform_indices = @transform_4, window_bounds = array<i64: 8, 128>}, {transform_indices = @transform_5, window_bounds = array<i64: 8, 128>}]} {
    %c0_i32 = arith.constant 0 : i32
    %0 = arith.cmpi eq, %arg1, %c0_i32 : i32
    %1 = arith.extui %0 : i1 to i32
    %c0_i32_0 = arith.constant 0 : i32
    %2 = arith.cmpi ne, %1, %c0_i32_0 : i32
    scf.if %2 {
      %cst_33 = arith.constant 0.000000e+00 : f32
      %54 = vector.broadcast %cst_33 : f32 to vector<16x128xf32>
      %c0_34 = arith.constant 0 : index
      %c0_35 = arith.constant 0 : index
      %55 = vector.load %arg8[%c0_34, %c0_35] : memref<16x128xf32, #tpu.memory_space<vmem>>, vector<16x128xf32>
      tpu.vector_store %arg8[%c0_34, %c0_35], %54 {strides = array<i32>} : memref<16x128xf32, #tpu.memory_space<vmem>>, vector<16x128xf32>,
      %cst_36 = arith.constant 0.000000e+00 : f32
      %56 = vector.broadcast %cst_36 : f32 to vector<16x128xf32>
      %c0_37 = arith.constant 0 : index
      %c0_38 = arith.constant 0 : index
      %57 = vector.load %arg9[%c0_37, %c0_38] : memref<16x128xf32, #tpu.memory_space<vmem>>, vector<16x128xf32>
      tpu.vector_store %arg9[%c0_37, %c0_38], %56 {strides = array<i32>} : memref<16x128xf32, #tpu.memory_space<vmem>>, vector<16x128xf32>,
    } else {
    }
    %c0 = arith.constant 0 : index
    %c0_1 = arith.constant 0 : index
    %3 = vector.load %arg4[%c0, %c0_1] : memref<16x128xf32, #tpu.memory_space<vmem>>, vector<16x128xf32>
    %c0_2 = arith.constant 0 : index
    %c0_3 = arith.constant 0 : index
    %4 = vector.load %arg5[%c0_2, %c0_3] : memref<16x128xf32, #tpu.memory_space<vmem>>, vector<16x128xf32>
    %c0_4 = arith.constant 0 : index
    %c0_5 = arith.constant 0 : index
    %5 = vector.load %arg2[%c0_4, %c0_5] : memref<16x16xf32, #tpu.memory_space<vmem>>, vector<16x16xf32>
    %c0_6 = arith.constant 0 : index
    %c0_7 = arith.constant 0 : index
    %6 = vector.load %arg3[%c0_6, %c0_7] : memref<128x128xf32, #tpu.memory_space<vmem>>, vector<128x128xf32>
    %cst = arith.constant dense<0.000000e+00> : vector<16x128xf32>
    %7 = tpu.matmul %5, %3, %cst {dimension_numbers = #tpu.dot_dimension_numbers<[1], [0], [0], [1], [0, 0, 1, 1], [], []>} : vector<16x16xf32>, vector<16x128xf32>, vector<16x128xf32> -> vector<16x128xf32>
    %cst_8 = arith.constant dense<0.000000e+00> : vector<16x128xf32>
    %8 = tpu.matmul %7, %6, %cst_8 {dimension_numbers = #tpu.dot_dimension_numbers<[1], [0], [0], [1], [0, 0, 1, 1], [], []>} : vector<16x128xf32>, vector<128x128xf32>, vector<16x128xf32> -> vector<16x128xf32>
    %cst_9 = arith.constant dense<0.000000e+00> : vector<16x128xf32>
    %9 = tpu.matmul %5, %4, %cst_9 {dimension_numbers = #tpu.dot_dimension_numbers<[1], [0], [0], [1], [0, 0, 1, 1], [], []>} : vector<16x16xf32>, vector<16x128xf32>, vector<16x128xf32> -> vector<16x128xf32>
    %cst_10 = arith.constant dense<0.000000e+00> : vector<16x128xf32>
    %10 = tpu.matmul %9, %6, %cst_10 {dimension_numbers = #tpu.dot_dimension_numbers<[1], [0], [0], [1], [0, 0, 1, 1], [], []>} : vector<16x128xf32>, vector<128x128xf32>, vector<16x128xf32> -> vector<16x128xf32>
    %11 = arith.mulf %3, %3 : vector<16x128xf32>
    %cst_11 = arith.constant dense<0.000000e+00> : vector<16x128xf32>
    %12 = tpu.matmul %5, %11, %cst_11 {dimension_numbers = #tpu.dot_dimension_numbers<[1], [0], [0], [1], [0, 0, 1, 1], [], []>} : vector<16x16xf32>, vector<16x128xf32>, vector<16x128xf32> -> vector<16x128xf32>
    %cst_12 = arith.constant dense<0.000000e+00> : vector<16x128xf32>
    %13 = tpu.matmul %12, %6, %cst_12 {dimension_numbers = #tpu.dot_dimension_numbers<[1], [0], [0], [1], [0, 0, 1, 1], [], []>} : vector<16x128xf32>, vector<128x128xf32>, vector<16x128xf32> -> vector<16x128xf32>
    %14 = arith.mulf %4, %4 : vector<16x128xf32>
    %cst_13 = arith.constant dense<0.000000e+00> : vector<16x128xf32>
    %15 = tpu.matmul %5, %14, %cst_13 {dimension_numbers = #tpu.dot_dimension_numbers<[1], [0], [0], [1], [0, 0, 1, 1], [], []>} : vector<16x16xf32>, vector<16x128xf32>, vector<16x128xf32> -> vector<16x128xf32>
    %cst_14 = arith.constant dense<0.000000e+00> : vector<16x128xf32>
    %16 = tpu.matmul %15, %6, %cst_14 {dimension_numbers = #tpu.dot_dimension_numbers<[1], [0], [0], [1], [0, 0, 1, 1], [], []>} : vector<16x128xf32>, vector<128x128xf32>, vector<16x128xf32> -> vector<16x128xf32>
    %17 = arith.mulf %3, %4 : vector<16x128xf32>
    %cst_15 = arith.constant dense<0.000000e+00> : vector<16x128xf32>
    %18 = tpu.matmul %5, %17, %cst_15 {dimension_numbers = #tpu.dot_dimension_numbers<[1], [0], [0], [1], [0, 0, 1, 1], [], []>} : vector<16x16xf32>, vector<16x128xf32>, vector<16x128xf32> -> vector<16x128xf32>
    %cst_16 = arith.constant dense<0.000000e+00> : vector<16x128xf32>
    %19 = tpu.matmul %18, %6, %cst_16 {dimension_numbers = #tpu.dot_dimension_numbers<[1], [0], [0], [1], [0, 0, 1, 1], [], []>} : vector<16x128xf32>, vector<128x128xf32>, vector<16x128xf32> -> vector<16x128xf32>
    %20 = arith.mulf %8, %8 : vector<16x128xf32>
    %21 = arith.mulf %10, %10 : vector<16x128xf32>
    %22 = arith.mulf %8, %10 : vector<16x128xf32>
    %23 = arith.subf %13, %20 : vector<16x128xf32>
    %24 = arith.subf %16, %21 : vector<16x128xf32>
    %25 = arith.subf %19, %22 : vector<16x128xf32>
    %cst_17 = arith.constant 2.000000e+00 : f32
    %26 = vector.broadcast %cst_17 : f32 to vector<16x128xf32>
    %27 = arith.mulf %26, %22 : vector<16x128xf32>
    %cst_18 = arith.constant 9.99999974E-5 : f32
    %28 = vector.broadcast %cst_18 : f32 to vector<16x128xf32>
    %29 = arith.addf %27, %28 : vector<16x128xf32>
    %cst_19 = arith.constant 2.000000e+00 : f32
    %30 = vector.broadcast %cst_19 : f32 to vector<16x128xf32>
    %31 = arith.mulf %30, %25 : vector<16x128xf32>
    %cst_20 = arith.constant 8.99999984E-4 : f32
    %32 = vector.broadcast %cst_20 : f32 to vector<16x128xf32>
    %33 = arith.addf %31, %32 : vector<16x128xf32>
    %34 = arith.mulf %29, %33 : vector<16x128xf32>
    %35 = arith.addf %20, %21 : vector<16x128xf32>
    %cst_21 = arith.constant 9.99999974E-5 : f32
    %36 = vector.broadcast %cst_21 : f32 to vector<16x128xf32>
    %37 = arith.addf %35, %36 : vector<16x128xf32>
    %38 = arith.addf %23, %24 : vector<16x128xf32>
    %cst_22 = arith.constant 8.99999984E-4 : f32
    %39 = vector.broadcast %cst_22 : f32 to vector<16x128xf32>
    %40 = arith.addf %38, %39 : vector<16x128xf32>
    %41 = arith.mulf %37, %40 : vector<16x128xf32>
    %42 = arith.divf %34, %41 : vector<16x128xf32>
    %43 = arith.subf %3, %4 : vector<16x128xf32>
    %c0_23 = arith.constant 0 : index
    %c0_24 = arith.constant 0 : index
    %44 = vector.load %arg8[%c0_23, %c0_24] : memref<16x128xf32, #tpu.memory_space<vmem>>, vector<16x128xf32>
    %45 = arith.addf %44, %42 : vector<16x128xf32>
    %c0_25 = arith.constant 0 : index
    %c0_26 = arith.constant 0 : index
    %46 = vector.load %arg8[%c0_25, %c0_26] : memref<16x128xf32, #tpu.memory_space<vmem>>, vector<16x128xf32>
    tpu.vector_store %arg8[%c0_25, %c0_26], %45 {strides = array<i32>} : memref<16x128xf32, #tpu.memory_space<vmem>>, vector<16x128xf32>,
    %c0_27 = arith.constant 0 : index
    %c0_28 = arith.constant 0 : index
    %47 = vector.load %arg9[%c0_27, %c0_28] : memref<16x128xf32, #tpu.memory_space<vmem>>, vector<16x128xf32>
    %48 = arith.mulf %43, %43 : vector<16x128xf32>
    %49 = arith.addf %47, %48 : vector<16x128xf32>
    %c0_29 = arith.constant 0 : index
    %c0_30 = arith.constant 0 : index
    %50 = vector.load %arg9[%c0_29, %c0_30] : memref<16x128xf32, #tpu.memory_space<vmem>>, vector<16x128xf32>
    tpu.vector_store %arg9[%c0_29, %c0_30], %49 {strides = array<i32>} : memref<16x128xf32, #tpu.memory_space<vmem>>, vector<16x128xf32>,
    %c0_i32_31 = arith.constant 0 : i32
    %51 = arith.cmpi eq, %arg1, %c0_i32_31 : i32
    %52 = arith.extui %51 : i1 to i32
    %c0_i32_32 = arith.constant 0 : i32
    %53 = arith.cmpi ne, %52, %c0_i32_32 : i32
    scf.if %53 {
      %c0_33 = arith.constant 0 : index
      %c0_34 = arith.constant 0 : index
      %54 = vector.load %arg8[%c0_33, %c0_34] : memref<16x128xf32, #tpu.memory_space<vmem>>, vector<16x128xf32>
      %55 = vector.shape_cast %54 : vector<16x128xf32> to vector<1x16x128xf32>
      %cst_35 = arith.constant dense<0.000000e+00> : vector<1xf32>
      %56 = vector.multi_reduction <add>, %55, %cst_35 [1, 2] : vector<1x16x128xf32> to vector<1xf32>
      %57 = vector.shape_cast %56 : vector<1xf32> to vector<1x1x1xf32>
      %58 = vector.extract %57[0, 0, 0] : f32 from vector<1x1x1xf32>
      %59 = vector.broadcast %58 : f32 to vector<8x128xf32>
      %c0_36 = arith.constant 0 : index
      %c0_37 = arith.constant 0 : index
      %60 = vector.load %arg6[%c0_36, %c0_37] : memref<8x128xf32, #tpu.memory_space<vmem>>, vector<8x128xf32>
      tpu.vector_store %arg6[%c0_36, %c0_37], %59 {strides = array<i32>} : memref<8x128xf32, #tpu.memory_space<vmem>>, vector<8x128xf32>,
      %c0_38 = arith.constant 0 : index
      %c0_39 = arith.constant 0 : index
      %61 = vector.load %arg9[%c0_38, %c0_39] : memref<16x128xf32, #tpu.memory_space<vmem>>, vector<16x128xf32>
      %62 = vector.shape_cast %61 : vector<16x128xf32> to vector<1x16x128xf32>
      %cst_40 = arith.constant dense<0.000000e+00> : vector<1xf32>
      %63 = vector.multi_reduction <add>, %62, %cst_40 [1, 2] : vector<1x16x128xf32> to vector<1xf32>
      %64 = vector.shape_cast %63 : vector<1xf32> to vector<1x1x1xf32>
      %65 = vector.extract %64[0, 0, 0] : f32 from vector<1x1x1xf32>
      %66 = vector.broadcast %65 : f32 to vector<8x128xf32>
      %c0_41 = arith.constant 0 : index
      %c0_42 = arith.constant 0 : index
      %67 = vector.load %arg7[%c0_41, %c0_42] : memref<8x128xf32, #tpu.memory_space<vmem>>, vector<8x128xf32>
      tpu.vector_store %arg7[%c0_41, %c0_42], %66 {strides = array<i32>} : memref<8x128xf32, #tpu.memory_space<vmem>>, vector<8x128xf32>,
    } else {
    }
    return
  }
  func.func @transform_0(%arg0: i32, %arg1: i32) -> (i32, i32) {
    %c0_i32 = arith.constant 0 : i32
    %c0_i32_0 = arith.constant 0 : i32
    %c0_i32_1 = arith.constant 0 : i32
    return %c0_i32, %c0_i32_0 : i32, i32
  }
  func.func @transform_1(%arg0: i32, %arg1: i32) -> (i32, i32) {
    %c0_i32 = arith.constant 0 : i32
    %c0_i32_0 = arith.constant 0 : i32
    %c0_i32_1 = arith.constant 0 : i32
    return %c0_i32, %c0_i32_0 : i32, i32
  }
  func.func @transform_2(%arg0: i32, %arg1: i32) -> (i32, i32) {
    %c1_i32 = arith.constant 1 : i32
    %0 = arith.muli %arg0, %c1_i32 : i32
    %1 = arith.addi %0, %arg1 : i32
    %c0_i32 = arith.constant 0 : i32
    %c0_i32_0 = arith.constant 0 : i32
    return %c0_i32, %1 : i32, i32
  }
  func.func @transform_3(%arg0: i32, %arg1: i32) -> (i32, i32) {
    %c1_i32 = arith.constant 1 : i32
    %0 = arith.muli %arg0, %c1_i32 : i32
    %1 = arith.addi %0, %arg1 : i32
    %c0_i32 = arith.constant 0 : i32
    %c0_i32_0 = arith.constant 0 : i32
    return %c0_i32, %1 : i32, i32
  }
  func.func @transform_4(%arg0: i32, %arg1: i32) -> (i32, i32) {
    %c0_i32 = arith.constant 0 : i32
    %c0_i32_0 = arith.constant 0 : i32
    return %arg0, %c0_i32 : i32, i32
  }
  func.func @transform_5(%arg0: i32, %arg1: i32) -> (i32, i32) {
    %c0_i32 = arith.constant 0 : i32
    %c0_i32_0 = arith.constant 0 : i32
    return %arg0, %c0_i32 : i32, i32
  }
}

</mosaic_0001>

<bundles_post_ra>
// kernel: tpu_custom_call.1
= control target key start
LH: loop header
LB: loop body
LE: loop exit
PB: predicated region body
PF: predicated region fallthrough
CT: control target
= control target key end

     0   :  { %11 = vsyncpa [#allocation5], 0  ;;  %s1793_s0 = inlined_call_operand.hbm [shape: f32[16,16], index: 0, kind: input, shape index: {}]   ;;  %s1794_s1 = inlined_call_operand.hbm [shape: f32[128,128], index: 1, kind: input, shape index: {}]   ;;  %s1795_s2 = inlined_call_operand.hbm [shape: f32[16,128], index: 2, kind: input, shape index: {}]   ;;  %s1796_s3 = inlined_call_operand.hbm [shape: f32[16,128], index: 3, kind: input, shape index: {}]   ;;  %s1797_s4 = inlined_call_operand.hbm [shape: f32[8,128], index: 4, kind: output, shape index: {0}]   ;;  %s1798_s5 = inlined_call_operand.hbm [shape: f32[8,128], index: 5, kind: output, shape index: {1}]  }
   0x1   :  { %12 = vsyncpa [#allocation8], 0 }
   0x2   :  { %13 = vsyncpa [#allocation11], 0 }
   0x3   :  { %14 = vsyncpa [#allocation6], 0 }
   0x4   :  { %15 = vsyncpa [#allocation14], 0  ;;  %s1467_s18 = smov [#allocation7]   ;;  %s1468_s20 = smov [#allocation4]  }
   0x5   :  { %s33_s19 = sshll.u32 %s1467_s18, 4  ;;  %s21_s21 = sshll.u32 %s1468_s20, 4  ;;  %s34_s19 = int_to_ptr.vmem [resolvable:$true] %s33_s19  ;;  %s22_s21 = int_to_ptr.vmem [resolvable:$true] %s21_s21 }
   0x6   :  { %s1345_s22 = scalar_lea.vmem %s34_s19, 2048  ;;  %p1350_p1 = scmp.lt.s32.totalorder %s34_s19, %s34_s19 }
   0x7   :  { %p1346_p0 = scmp.ne.s32.totalorder %s34_s19, %s1345_s22  ;;  %p1351_p2 = scmp.lt.s32.totalorder %s1345_s22, %s1345_s22 }
   0x9   :  { %p1352_p3 = por %p1351_p2, %p1350_p1 }
   0xb   :  { %p1353_p4 = pnand %p1352_p3, %p1346_p0 }
   0xd   :  { %1356 = shalt.err (!%p1353_p4)
}
   0xe   :  { %s1469_s23 = smov 128   ;;  %s1470_s24 = smov 8  }
   0xf   :  { %39 = dma.hbm_to_vmem [thread:$0]  %s1794_s1, 2048, %s34_s19, [#allocation8], %s1469_s23, %s1469_s23, %s1470_s24  }
  0x10   :  { %s1365_s27 = scalar_lea.vmem %s22_s21, 256  ;;  %p1370_p6 = scmp.lt.s32.totalorder %s22_s21, %s22_s21 }
  0x11   :  { %p1366_p5 = scmp.ne.s32.totalorder %s22_s21, %s1365_s27  ;;  %p1371_p7 = scmp.lt.s32.totalorder %s1365_s27, %s1365_s27 }
  0x13   :  { %p1372_p8 = por %p1371_p7, %p1370_p6 }
  0x15   :  { %p1373_p9 = pnand %p1372_p8, %p1366_p5 }
  0x17   :  { %1376 = shalt.err (!%p1373_p9)
}
  0x18   :  { %27 = dma.hbm_to_vmem [thread:$0]  %s1793_s0, 256, %s22_s21, [#allocation5], %s1469_s23, %s1469_s23, %s1470_s24  }
  0x19   :  { %s1471_s30 = smov [#allocation9]   ;;  %s1472_s7 = smov [#allocation10]  }
  0x1a   :  { %s48_s6 = sshll.u32 %s1471_s30, 4  ;;  %s63_s8 = sshll.u32 %s1472_s7, 4  ;;  %s49_s6 = int_to_ptr.vmem [resolvable:$true] %s48_s6  ;;  %s64_s8 = int_to_ptr.vmem [resolvable:$true] %s63_s8 }
  0x1b   :  { %s1385_s1 = scalar_lea.vmem %s49_s6, 256  ;;  %p1390_p11 = scmp.lt.s32.totalorder %s49_s6, %s49_s6 }
  0x1c   :  { %p1386_p10 = scmp.ne.s32.totalorder %s49_s6, %s1385_s1  ;;  %p1391_p12 = scmp.lt.s32.totalorder %s1385_s1, %s1385_s1 }
  0x1e   :  { %p1392_p13 = por %p1391_p12, %p1390_p11 }
  0x20   :  { %p1393_p0 = pnand %p1392_p13, %p1386_p10 }
  0x22   :  { %1396 = shalt.err (!%p1393_p0)
}
  0x23   :  { %54 = dma.hbm_to_vmem [thread:$0]  %s1795_s2, 256, %s49_s6, [#allocation8], %s1469_s23, %s1469_s23, %s1470_s24  }
  0x24   :  { %s1405_s0 = scalar_lea.vmem %s64_s8, 256  ;;  %p1410_p2 = scmp.lt.s32.totalorder %s64_s8, %s64_s8 }
  0x25   :  { %p1406_p1 = scmp.ne.s32.totalorder %s64_s8, %s1405_s0  ;;  %p1411_p3 = scmp.lt.s32.totalorder %s1405_s0, %s1405_s0 }
  0x27   :  { %p1412_p4 = por %p1411_p3, %p1410_p2 }
  0x29   :  { %p1413_p5 = pnand %p1412_p4, %p1406_p1 }
  0x2b   :  { %1416 = shalt.err (!%p1413_p5)
}
  0x2c   :  { %69 = dma.hbm_to_vmem [thread:$0]  %s1796_s3, 256, %s64_s8, [#allocation11], %s1469_s23, %s1469_s23, %s1470_s24  }
  0x2d   :  { %1457 = dma.done.wait [#allocation5], 256  }
  0x2e   :  { %1458 = vsyncadd [#allocation5], 4294967040 }
  0x2f   :  { %1459 = dma.done.wait [#allocation8], 2304  }
  0x30   :  { %1460 = vsyncadd [#allocation8], 4294964992 }
  0x31   :  { %1461 = dma.done.wait [#allocation11], 256  }
  0x32   :  { %1462 = vsyncadd [#allocation11], 4294967040  ;;  %vm114_vm0 = vcmask 130048   ;;  %v1529_v0 = vld [vmem:[#allocation9 + $0x8] sm:$0xff]  ;;  %v1531_v1 = vld [vmem:[#allocation9] sm:$0xff]  ;;  %s1473_s2 = smov [#allocation12]  }
  0x33   :  { %v1533_v2 = vld [vmem:[#allocation4] sm:$0xff]  ;;  %1111 = vmatprep.subr.mxu0 %v1529_v0  ;;  %v1539_v3 = vld [vmem:[#allocation4 + $0x8] sm:$0xff]  ;;  %v1559_v8 = vld [vmem:[#allocation7 + $0x68] sm:$0xff]  ;;  %v422_v22 = vmul.f32 %v1529_v0, %v1529_v0  ;;  %v421_v27 = vmul.f32 %v1531_v1, %v1531_v1  ;;  %s966_s3 = sshll.u32 %s1473_s2, 4  ;;  %s1474_s14 = smov [#allocation13]   ;;  %s967_s3 = int_to_ptr.vmem [resolvable:$true] %s966_s3 }
  0x34   :  { %1115 = vmatprep.mubr.msk.f32.mxu0 %vm114_vm0, %v1533_v2  ;;  %1112 = vmatpush3.msra.mxu0 %v1529_v0  ;;  %v1541_v4 = vld [vmem:[#allocation10 + $0x8] sm:$0xff]  ;;  %v1548_v6 = vld [vmem:[#allocation10] sm:$0xff]  ;;  %v1565_v9 = vld [vmem:[#allocation7 + $0x60] sm:$0xff]  ;;  %s976_s15 = sshll.u32 %s1474_s14, 4  ;;  %s1417_s16 = scalar_lea.vmem %s967_s3, 128  ;;  %s977_s15 = int_to_ptr.vmem [resolvable:$true] %s976_s15 }
  0x35   :  { %v1543_v5 = vld [vmem:[#allocation7 + $0x78] sm:$0xff]  ;;  %1113 = vmatprep.subr.mxu0 %v1531_v1  ;;  %v1551_v7 = vld [vmem:[#allocation7 + $0x70] sm:$0xff]  ;;  %v1584_v12 = vld [vmem:[#allocation7 + $0x48] sm:$0xff]  ;;  %v574_v28 = vmul.f32 %v1541_v4, %v1541_v4  ;;  %v573_v29 = vmul.f32 %v1548_v6, %v1548_v6  ;;  %v726_v30 = vmul.f32 %v1541_v4, %v1529_v0  ;;  %v725_v37 = vmul.f32 %v1548_v6, %v1531_v1  ;;  %p1418_p6 = scmp.ne.s32.totalorder %s967_s3, %s1417_s16  ;;  %p1422_p7 = scmp.lt.s32.totalorder %s967_s3, %s967_s3 }
  0x36   :  { %1118 = vmatprep.subr.mxu1 %v1543_v5  ;;  %1114 = vmatpush3.msra.mxu0 %v1531_v1  ;;  %v1572_v10 = vld [vmem:[#allocation7 + $0x58] sm:$0xff]  ;;  %v1578_v11 = vld [vmem:[#allocation7 + $0x50] sm:$0xff]  ;;  %v1590_v13 = vld [vmem:[#allocation7 + $0x40] sm:$0xff]  ;;  %p1423_p8 = scmp.lt.s32.totalorder %s1417_s16, %s1417_s16 }
  0x37   :  { %1119 = vmatpush3.msra.mxu1 %v1543_v5  ;;  %1116 = vmatmul.mubr.msk.f32.vlgmr.msra.gmra.mxu0 %vm114_vm0, %v1539_v3  ;;  %v1596_v14 = vld [vmem:[#allocation7 + $0x38] sm:$0xff]  ;;  %v1602_v15 = vld [vmem:[#allocation7 + $0x30] sm:$0xff]  ;;  %v1608_v16 = vld [vmem:[#allocation7 + $0x28] sm:$0xff] }
  0x38   :  { %1153 = vmatprep.subr.mxu0 %v1541_v4  ;;  %1157 = vmatprep.mubr.msk.f32.mxu0 %vm114_vm0, %v1533_v2  ;;  %v1614_v17 = vld [vmem:[#allocation7 + $0x20] sm:$0xff]  ;;  %v1620_v18 = vld [vmem:[#allocation7 + $0x18] sm:$0xff]  ;;  %v1626_v19 = vld [vmem:[#allocation7 + $0x10] sm:$0xff]  ;;  %p1424_p9 = por %p1423_p8, %p1422_p7 }
  0x39   :  { %1154 = vmatpush3.msra.mxu0 %v1541_v4  ;;  %1120 = vmatprep.subr.mxu1 %v1551_v7  ;;  %v1641_v20 = vld [vmem:[#allocation7 + $0x8] sm:$0xff]  ;;  %v1646_v21 = vld [vmem:[#allocation7] sm:$0xff] }
  0x3a   :  { %1155 = vmatprep.subr.mxu0 %v1548_v6  ;;  %1121 = vmatpush3.msra.mxu1 %v1551_v7  ;;  %p1425_p10 = pnand %p1424_p9, %p1418_p6 }
  0x3b   :  { %1156 = vmatpush3.msra.mxu0 %v1548_v6  ;;  %1122 = vmatprep.subr.mxu1 %v1559_v8 }
  0x3c   :  { %1158 = vmatmul.mubr.msk.f32.vlgmr.msra.gmra.mxu0 %vm114_vm0, %v1539_v3  ;;  %1160 = vmatprep.subr.mxu0 %v1543_v5 }
  0x3d   :  { %1123 = vmatpush3.msra.mxu1 %v1559_v8  ;;  %1161 = vmatpush3.msra.mxu0 %v1543_v5 }
  0x3e   :  { %1124 = vmatprep.subr.mxu1 %v1565_v9  ;;  %1162 = vmatprep.subr.mxu0 %v1551_v7 }
  0x3f   :  { %1125 = vmatpush3.msra.mxu1 %v1565_v9  ;;  %1163 = vmatpush3.msra.mxu0 %v1551_v7 }
  0x40   :  { %1126 = vmatprep.subr.mxu1 %v1572_v10  ;;  %1164 = vmatprep.subr.mxu0 %v1559_v8 }
  0x41   :  { %1127 = vmatpush3.msra.mxu1 %v1572_v10  ;;  %1165 = vmatpush3.msra.mxu0 %v1559_v8 }
  0x42   :  { %1128 = vmatprep.subr.mxu1 %v1578_v11  ;;  %1166 = vmatprep.subr.mxu0 %v1565_v9 }
  0x43   :  { %1129 = vmatpush3.msra.mxu1 %v1578_v11  ;;  %1167 = vmatpush3.msra.mxu0 %v1565_v9 }
  0x44   :  { %1130 = vmatprep.subr.mxu1 %v1584_v12  ;;  %1168 = vmatprep.subr.mxu0 %v1572_v10 }
  0x45   :  { %1131 = vmatpush3.msra.mxu1 %v1584_v12  ;;  %1169 = vmatpush3.msra.mxu0 %v1572_v10 }
  0x46   :  { %1132 = vmatprep.subr.mxu1 %v1590_v13  ;;  %1170 = vmatprep.subr.mxu0 %v1578_v11 }
  0x47   :  { %1133 = vmatpush3.msra.mxu1 %v1590_v13  ;;  %1171 = vmatpush3.msra.mxu0 %v1578_v11 }
  0x48   :  { %1134 = vmatprep.subr.mxu1 %v1596_v14  ;;  %1172 = vmatprep.subr.mxu0 %v1584_v12 }
  0x49   :  { %1135 = vmatpush3.msra.mxu1 %v1596_v14  ;;  %1173 = vmatpush3.msra.mxu0 %v1584_v12 }
  0x4a   :  { %1136 = vmatprep.subr.mxu1 %v1602_v15  ;;  %1174 = vmatprep.subr.mxu0 %v1590_v13 }
  0x4b   :  { %1137 = vmatpush3.msra.mxu1 %v1602_v15  ;;  %1175 = vmatpush3.msra.mxu0 %v1590_v13 }
  0x4c   :  { %1138 = vmatprep.subr.mxu1 %v1608_v16  ;;  %1176 = vmatprep.subr.mxu0 %v1596_v14 }
  0x4d   :  { %1139 = vmatpush3.msra.mxu1 %v1608_v16  ;;  %1177 = vmatpush3.msra.mxu0 %v1596_v14 }
  0x4e   :  { %1140 = vmatprep.subr.mxu1 %v1614_v17  ;;  %1178 = vmatprep.subr.mxu0 %v1602_v15 }
  0x4f   :  { %1141 = vmatpush3.msra.mxu1 %v1614_v17  ;;  %1179 = vmatpush3.msra.mxu0 %v1602_v15 }
  0x50   :  { %1142 = vmatprep.subr.mxu1 %v1620_v18  ;;  %1180 = vmatprep.subr.mxu0 %v1608_v16 }
  0x51   :  { %1143 = vmatpush3.msra.mxu1 %v1620_v18  ;;  %1181 = vmatpush3.msra.mxu0 %v1608_v16 }
  0x52   :  { %1144 = vmatprep.subr.mxu1 %v1626_v19  ;;  %1182 = vmatprep.subr.mxu0 %v1614_v17 }
  0x53   :  { %1145 = vmatpush3.msra.mxu1 %v1626_v19  ;;  %1183 = vmatpush3.msra.mxu0 %v1614_v17 }
  0x54   :  { %1184 = vmatprep.subr.mxu0 %v1620_v18  ;;  %1146 = vmatprep.subr.mxu1 %v1641_v20 }
  0x55   :  { %1185 = vmatpush3.msra.mxu0 %v1620_v18  ;;  %1147 = vmatpush3.msra.mxu1 %v1641_v20 }
  0x56   :  { %1186 = vmatprep.subr.mxu0 %v1626_v19  ;;  %1148 = vmatprep.subr.mxu1 %v1646_v21 }
  0x57   :  { %1187 = vmatpush3.msra.mxu0 %v1626_v19  ;;  %1149 = vmatpush3.msra.mxu1 %v1646_v21 }
  0x58   :  { %1188 = vmatprep.subr.mxu0 %v1641_v20  ;;  %1202 = vmatprep.subr.mxu1 %v1543_v5 }
  0x59   :  { %1189 = vmatpush3.msra.mxu0 %v1641_v20 }
  0x5a   :  { %1190 = vmatprep.subr.mxu0 %v1646_v21 }
  0x5b   :  { %1191 = vmatpush3.msra.mxu0 %v1646_v21 }
  0x5c   :  { %1195 = vmatprep.subr.mxu0 %v422_v22 }
  0xf7   :  { %v1117_v23 = vpop.f32.mrf.mxu0 }
  0xf9   :  { %v187_v24 = vpop.f32.mrf.mxu0 }
  0xfa   :  { %1150 = vmatprep.mubr.f32.mxu1 %v187_v24 }
  0xfb   :  { %1151 = vmatmul.mubr.f32.vlgmr.msra.gmra.mxu1 %v1117_v23 }
  0xfc   :  { %v1159_v25 = vpop.f32.mrf.mxu0  ;;  %1203 = vmatpush3.msra.mxu1 %v1543_v5 }
  0xfd   :  { %1204 = vmatprep.subr.mxu1 %v1551_v7 }
  0xfe   :  { %v337_v26 = vpop.f32.mrf.mxu0  ;;  %1205 = vmatpush3.msra.mxu1 %v1551_v7 }
  0xff   :  { %1192 = vmatprep.mubr.f32.mxu0 %v337_v26  ;;  %1206 = vmatprep.subr.mxu1 %v1559_v8 }
 0x100   :  { %1193 = vmatmul.mubr.f32.vlgmr.msra.gmra.mxu0 %v1159_v25  ;;  %1207 = vmatpush3.msra.mxu1 %v1559_v8 }
 0x101   :  { %1196 = vmatpush3.msra.mxu0 %v422_v22  ;;  %1199 = vmatprep.mubr.msk.f32.mxu0 %vm114_vm0, %v1533_v2 }
 0x102   :  { %1197 = vmatprep.subr.mxu0 %v421_v27  ;;  %1208 = vmatprep.subr.mxu1 %v1565_v9 }
 0x103   :  { %1198 = vmatpush3.msra.mxu0 %v421_v27  ;;  %1209 = vmatpush3.msra.mxu1 %v1565_v9 }
 0x104   :  { %1200 = vmatmul.mubr.msk.f32.vlgmr.msra.gmra.mxu0 %vm114_vm0, %v1539_v3  ;;  %1237 = vmatprep.subr.mxu0 %v574_v28 }
 0x105   :  { %1238 = vmatpush3.msra.mxu0 %v574_v28  ;;  %1241 = vmatprep.mubr.msk.f32.mxu0 %vm114_vm0, %v1533_v2 }
 0x106   :  { %1239 = vmatprep.subr.mxu0 %v573_v29  ;;  %1210 = vmatprep.subr.mxu1 %v1572_v10 }
 0x107   :  { %1240 = vmatpush3.msra.mxu0 %v573_v29  ;;  %1211 = vmatpush3.msra.mxu1 %v1572_v10 }
 0x108   :  { %1242 = vmatmul.mubr.msk.f32.vlgmr.msra.gmra.mxu0 %vm114_vm0, %v1539_v3  ;;  %1244 = vmatprep.subr.mxu0 %v1543_v5 }
 0x109   :  { %1245 = vmatpush3.msra.mxu0 %v1543_v5  ;;  %1212 = vmatprep.subr.mxu1 %v1578_v11 }
 0x10a   :  { %1246 = vmatprep.subr.mxu0 %v1551_v7  ;;  %1213 = vmatpush3.msra.mxu1 %v1578_v11 }
 0x10b   :  { %1247 = vmatpush3.msra.mxu0 %v1551_v7  ;;  %1214 = vmatprep.subr.mxu1 %v1584_v12 }
 0x10c   :  { %1248 = vmatprep.subr.mxu0 %v1559_v8  ;;  %1215 = vmatpush3.msra.mxu1 %v1584_v12 }
 0x10d   :  { %1249 = vmatpush3.msra.mxu0 %v1559_v8  ;;  %1216 = vmatprep.subr.mxu1 %v1590_v13 }
 0x10e   :  { %1250 = vmatprep.subr.mxu0 %v1565_v9  ;;  %1217 = vmatpush3.msra.mxu1 %v1590_v13 }
 0x10f   :  { %1251 = vmatpush3.msra.mxu0 %v1565_v9  ;;  %1218 = vmatprep.subr.mxu1 %v1596_v14 }
 0x110   :  { %1252 = vmatprep.subr.mxu0 %v1572_v10  ;;  %1219 = vmatpush3.msra.mxu1 %v1596_v14 }
 0x111   :  { %1253 = vmatpush3.msra.mxu0 %v1572_v10  ;;  %1220 = vmatprep.subr.mxu1 %v1602_v15 }
 0x112   :  { %1254 = vmatprep.subr.mxu0 %v1578_v11  ;;  %1221 = vmatpush3.msra.mxu1 %v1602_v15 }
 0x113   :  { %1255 = vmatpush3.msra.mxu0 %v1578_v11  ;;  %1222 = vmatprep.subr.mxu1 %v1608_v16 }
 0x114   :  { %1256 = vmatprep.subr.mxu0 %v1584_v12  ;;  %1223 = vmatpush3.msra.mxu1 %v1608_v16 }
 0x115   :  { %1257 = vmatpush3.msra.mxu0 %v1584_v12  ;;  %1224 = vmatprep.subr.mxu1 %v1614_v17 }
 0x116   :  { %1258 = vmatprep.subr.mxu0 %v1590_v13  ;;  %1225 = vmatpush3.msra.mxu1 %v1614_v17 }
 0x117   :  { %1259 = vmatpush3.msra.mxu0 %v1590_v13  ;;  %1226 = vmatprep.subr.mxu1 %v1620_v18 }
 0x118   :  { %1260 = vmatprep.subr.mxu0 %v1596_v14  ;;  %1227 = vmatpush3.msra.mxu1 %v1620_v18 }
 0x119   :  { %1261 = vmatpush3.msra.mxu0 %v1596_v14  ;;  %1228 = vmatprep.subr.mxu1 %v1626_v19 }
 0x11a   :  { %1262 = vmatprep.subr.mxu0 %v1602_v15  ;;  %1229 = vmatpush3.msra.mxu1 %v1626_v19 }
 0x11b   :  { %1263 = vmatpush3.msra.mxu0 %v1602_v15  ;;  %1230 = vmatprep.subr.mxu1 %v1641_v20 }
 0x11c   :  { %1264 = vmatprep.subr.mxu0 %v1608_v16  ;;  %1231 = vmatpush3.msra.mxu1 %v1641_v20 }
 0x11d   :  { %1265 = vmatpush3.msra.mxu0 %v1608_v16  ;;  %1232 = vmatprep.subr.mxu1 %v1646_v21 }
 0x11e   :  { %1266 = vmatprep.subr.mxu0 %v1614_v17  ;;  %1233 = vmatpush3.msra.mxu1 %v1646_v21 }
 0x11f   :  { %1267 = vmatpush3.msra.mxu0 %v1614_v17  ;;  %1286 = vmatprep.subr.mxu1 %v1543_v5 }
 0x120   :  { %1268 = vmatprep.subr.mxu0 %v1620_v18 }
 0x121   :  { %1269 = vmatpush3.msra.mxu0 %v1620_v18 }
 0x122   :  { %1270 = vmatprep.subr.mxu0 %v1626_v19 }
 0x123   :  { %1271 = vmatpush3.msra.mxu0 %v1626_v19 }
 0x124   :  { %1272 = vmatprep.subr.mxu0 %v1641_v20 }
 0x125   :  { %1273 = vmatpush3.msra.mxu0 %v1641_v20 }
 0x126   :  { %1274 = vmatprep.subr.mxu0 %v1646_v21 }
 0x127   :  { %1275 = vmatpush3.msra.mxu0 %v1646_v21 }
 0x128   :  { %1279 = vmatprep.subr.mxu0 %v726_v30 }
 0x1bb   :  { %v1152_v38 = vpop.f32.mrf.mxu1 }
 0x1bc   :  { %v878_v42 = vmul.f32 %v1152_v38, %v1152_v38 }
 0x1bd   :  { %v262_v39 = vpop.f32.mrf.mxu1 }
 0x1be   :  { %v877_v46 = vmul.f32 %v262_v39, %v262_v39 }
 0x1c0   :  { %v1736_v31 = vpop.f32.mrf.mxu0 }
 0x1c1   :  { %v880_v41 = vmul.f32 %v1736_v31, %v1736_v31 }
 0x1c2   :  { %v1738_v32 = vpop.f32.mrf.mxu0 }
 0x1c3   :  { %v879_v43 = vmul.f32 %v1738_v32, %v1738_v32  ;;  %v900_v47 = vadd.f32 %v880_v41, %v878_v42 }
 0x1c4   :  { %v1201_v33 = vpop.f32.mrf.mxu0 }
 0x1c5   :  { %v899_v51 = vadd.f32 %v879_v43, %v877_v46  ;;  %v902_v56 = vadd.f32 0.0001, %v900_v47 }
 0x1c6   :  { %v489_v34 = vpop.f32.mrf.mxu0 }
 0x1c7   :  { %1234 = vmatprep.mubr.f32.mxu1 %v489_v34  ;;  %v901_v60 = vadd.f32 0.0001, %v899_v51 }
 0x1c8   :  { %1235 = vmatmul.mubr.f32.vlgmr.msra.gmra.mxu1 %v1201_v33  ;;  %v1243_v35 = vpop.f32.mrf.mxu0 }
 0x1c9   :  { %1287 = vmatpush3.msra.mxu1 %v1543_v5 }
 0x1ca   :  { %v641_v36 = vpop.f32.mrf.mxu0  ;;  %1288 = vmatprep.subr.mxu1 %v1551_v7 }
 0x1cb   :  { %1276 = vmatprep.mubr.f32.mxu0 %v641_v36  ;;  %1289 = vmatpush3.msra.mxu1 %v1551_v7 }
 0x1cc   :  { %1277 = vmatmul.mubr.f32.vlgmr.msra.gmra.mxu0 %v1243_v35  ;;  %1290 = vmatprep.subr.mxu1 %v1559_v8 }
 0x1cd   :  { %1280 = vmatpush3.msra.mxu0 %v726_v30  ;;  %1283 = vmatprep.mubr.msk.f32.mxu0 %vm114_vm0, %v1533_v2  ;;  %v882_v2 = vmul.f32 %v1736_v31, %v1152_v38 }
 0x1ce   :  { %1281 = vmatprep.subr.mxu0 %v725_v37  ;;  %1291 = vmatpush3.msra.mxu1 %v1559_v8 }
 0x1cf   :  { %1282 = vmatpush3.msra.mxu0 %v725_v37  ;;  %1292 = vmatprep.subr.mxu1 %v1565_v9  ;;  %v890_v7 = vmul.f32 2.0, %v882_v2 }
 0x1d0   :  { %1284 = vmatmul.mubr.msk.f32.vlgmr.msra.gmra.mxu0 %vm114_vm0, %v1539_v3  ;;  %1293 = vmatpush3.msra.mxu1 %v1565_v9  ;;  %v881_v3 = vmul.f32 %v1738_v32, %v262_v39 }
 0x1d1   :  { %1294 = vmatprep.subr.mxu1 %v1572_v10 }
 0x1d2   :  { %1295 = vmatpush3.msra.mxu1 %v1572_v10  ;;  %v889_v9 = vmul.f32 2.0, %v881_v3 }
 0x1d3   :  { %1296 = vmatprep.subr.mxu1 %v1578_v11 }
 0x1d4   :  { %1297 = vmatpush3.msra.mxu1 %v1578_v11 }
 0x1d5   :  { %1298 = vmatprep.subr.mxu1 %v1584_v12 }
 0x1d6   :  { %1299 = vmatpush3.msra.mxu1 %v1584_v12 }
 0x1d7   :  { %1300 = vmatprep.subr.mxu1 %v1590_v13 }
 0x1d8   :  { %1301 = vmatpush3.msra.mxu1 %v1590_v13  ;;  %v892_v13 = vadd.f32 0.0001, %v890_v7 }
 0x1d9   :  { %1302 = vmatprep.subr.mxu1 %v1596_v14 }
 0x1da   :  { %1303 = vmatpush3.msra.mxu1 %v1596_v14 }
 0x1db   :  { %1304 = vmatprep.subr.mxu1 %v1602_v15 }
 0x1dc   :  { %1305 = vmatpush3.msra.mxu1 %v1602_v15 }
 0x1dd   :  { %1306 = vmatprep.subr.mxu1 %v1608_v16 }
 0x1de   :  { %1307 = vmatpush3.msra.mxu1 %v1608_v16  ;;  %v891_v16 = vadd.f32 0.0001, %v889_v9 }
 0x1df   :  { %1308 = vmatprep.subr.mxu1 %v1614_v17 }
 0x1e0   :  { %1309 = vmatpush3.msra.mxu1 %v1614_v17 }
 0x1e1   :  { %1310 = vmatprep.subr.mxu1 %v1620_v18 }
 0x1e2   :  { %1311 = vmatpush3.msra.mxu1 %v1620_v18 }
 0x1e3   :  { %1312 = vmatprep.subr.mxu1 %v1626_v19 }
 0x1e4   :  { %1313 = vmatpush3.msra.mxu1 %v1626_v19  ;;  %v913_v19 = vsub.f32 %v1531_v1, %v1548_v6 }
 0x1e5   :  { %1314 = vmatprep.subr.mxu1 %v1641_v20 }
 0x1e6   :  { %1315 = vmatpush3.msra.mxu1 %v1641_v20  ;;  %v914_v20 = vsub.f32 %v1529_v0, %v1541_v4  ;;  %v923_v26 = vmul.f32 %v913_v19, %v913_v19 }
 0x1e7   :  { %1316 = vmatprep.subr.mxu1 %v1646_v21 }
 0x1e8   :  { %1317 = vmatpush3.msra.mxu1 %v1646_v21  ;;  %v924_v27 = vmul.f32 %v914_v20, %v914_v20 }
 0x1ea   :  { %v948_v29 = vadd.f32 %v924_v27, %v923_v26 }
 0x288   :  { %v1236_v40 = vpop.f32.mrf.mxu1 }
 0x289   :  { %v884_v48 = vsub.f32 %v1236_v40, %v878_v42 }
 0x28a   :  { %v564_v44 = vpop.f32.mrf.mxu1 }
 0x28b   :  { %v883_v52 = vsub.f32 %v564_v44, %v877_v46 }
 0x28c   :  { %v1278_v45 = vpop.f32.mrf.mxu0 }
 0x28d   :  { %v886_v49 = vsub.f32 %v1278_v45, %v880_v41 }
 0x28e   :  { %v716_v50 = vpop.f32.mrf.mxu0 }
 0x28f   :  { %v904_v53 = vadd.f32 %v886_v49, %v884_v48  ;;  %v885_v54 = vsub.f32 %v716_v50, %v879_v43 }
 0x290   :  { %v1285_v55 = vpop.f32.mrf.mxu0 }
 0x291   :  { %v906_v57 = vadd.f32 0.0009, %v904_v53  ;;  %v903_v58 = vadd.f32 %v885_v54, %v883_v52 }
 0x292   :  { %v793_v59 = vpop.f32.mrf.mxu0 }
 0x293   :  { %v908_v61 = vmul.f32 %v906_v57, %v902_v56  ;;  %v905_v62 = vadd.f32 0.0009, %v903_v58  ;;  %1318 = vmatprep.mubr.f32.mxu1 %v793_v59 }
 0x294   :  { %1319 = vmatmul.mubr.f32.vlgmr.msra.gmra.mxu1 %v1285_v55 }
 0x295   :  { %v907_v63 = vmul.f32 %v905_v62, %v901_v60  ;;  %1333 = vrcp.f32 %v908_v61 }
 0x297   :  { %1335 = vrcp.f32 %v907_v63 }
 0x2a2   :  { %v1334_v21 = vpop.eup %1333 }
 0x2a4   :  { %v1336_v24 = vpop.eup %1335 }
 0x354   :  { %v1320_v5 = vpop.f32.mrf.mxu1 }
 0x355   :  { %v888_v8 = vsub.f32 %v1320_v5, %v882_v2 }
 0x356   :  { %v868_v10 = vpop.f32.mrf.mxu1 }
 0x357   :  { %v894_v11 = vmul.f32 2.0, %v888_v8  ;;  %v887_v12 = vsub.f32 %v868_v10, %v881_v3 }
 0x359   :  { %v896_v14 = vadd.f32 0.0009, %v894_v11  ;;  %v893_v15 = vmul.f32 2.0, %v887_v12 }
 0x35b   :  { %v898_v17 = vmul.f32 %v896_v14, %v892_v13  ;;  %v895_v18 = vadd.f32 0.0009, %v893_v15 }
 0x35d   :  { %v897_v22 = vmul.f32 %v895_v18, %v891_v16  ;;  %v912_v23 = vmul.f32 %v1334_v21, %v898_v17 }
 0x35f   :  { %v910_v25 = vmul.f32 %v1336_v24, %v897_v22 }
 0x361   :  { %v934_v28 = vadd.f32 %v912_v23, %v910_v25 }
 0x363   :  { %935 = vadd.xlane.f32.xlu0 %v934_v28 }
 0x367   :  { %949 = vadd.xlane.f32.xlu0 %v948_v29 }
 0x3ec   :  { %v936_v30 = vpop.xlane.xlu0 %935 }
 0x3ed   :  { %v937_v31 = vrot.slane %v936_v30, 4 }
 0x3ef   :  { %v938_v32 = vadd.f32 %v937_v31, %v936_v30 }
 0x3f0   :  { %v950_v33 = vpop.xlane.xlu0 %949 }
 0x3f1   :  { %v939_v34 = vrot.slane %v938_v32, 2  ;;  %v951_v1 = vrot.slane %v950_v33, 4 }
 0x3f3   :  { %v952_v6 = vadd.f32 %v951_v1, %v950_v33  ;;  %v940_v35 = vadd.f32 %v939_v34, %v938_v32 }
 0x3f5   :  { %v953_v0 = vrot.slane %v952_v6, 2  ;;  %v941_v4 = vrot.slane %v940_v35, 1 }
 0x3f7   :  { %v954_v36 = vadd.f32 %v953_v0, %v952_v6  ;;  %v942_v37 = vadd.f32 %v941_v4, %v940_v35 }
 0x3f9   :  { %1321 = vpush %v942_v37  ;;  %v955_v38 = vrot.slane %v954_v36, 1 }
 0x3fb   :  { %v956_v39 = vadd.f32 %v955_v38, %v954_v36 }
 0x3fd   :  { %1323 = vpush %v956_v39 }
 0x42a   :  { %s1322_s13 = spop %1321 }
 0x42b   :  { %v944_v40 = vstv %s1322_s13 }
 0x42c   :  { %945 = vst [vmem:[#allocation12] sm:$0xff] %v944_v40 }
 0x42d   :  { %1428 = shalt.err (!%p1425_p10)
}
 0x42e   :  { %969 = dma.vmem_to_hbm [thread:$0]  %s967_s3, 128, %s1797_s4, [#allocation6]  }
 0x42f   :  { %s1324_s19 = spop %1323  ;;  %s1437_s20 = scalar_lea.vmem %s977_s15, 128 }
 0x430   :  { %v958_v41 = vstv %s1324_s19  ;;  %p1438_p11 = scmp.ne.s32.totalorder %s977_s15, %s1437_s20  ;;  %p1442_p12 = scmp.lt.s32.totalorder %s977_s15, %s977_s15 }
 0x431   :  { %959 = vst [vmem:[#allocation13] sm:$0xff] %v958_v41  ;;  %p1443_p13 = scmp.lt.s32.totalorder %s1437_s20, %s1437_s20 }
 0x433   :  { %p1444_p0 = por %p1443_p13, %p1442_p12 }
 0x435   :  { %p1445_p1 = pnand %p1444_p0, %p1438_p11 }
 0x437   :  { %1448 = shalt.err (!%p1445_p1)
}
 0x438   :  { %979 = dma.vmem_to_hbm [thread:$0]  %s977_s15, 128, %s1798_s5, [#allocation14]  }
 0x439   :  { %1463 = dma.done.wait [#allocation6], 128  }
 0x43a   :  { %1464 = vsyncadd [#allocation6], 4294967168 }
 0x43b   :  { %1465 = dma.done.wait [#allocation14], 128  }
 0x43c   :  { %1466 = vsyncadd [#allocation14], 4294967168 }
 0x43d   :  { %986 = vsyncpa [#allocation5], 1 }
 0x43e   :  { %987 = vsyncpa [#allocation8], 1 }
 0x43f   :  { %988 = vsyncpa [#allocation11], 1 }
 0x440   :  { %989 = vsyncpa [#allocation6], 1 }
 0x441   :  { %990 = vsyncpa [#allocation14], 1 }

</bundles_post_ra>
